<compile_context>
chip_gen: v7x
topology: tpu7x:2x2x1
jax: 0.10.0
libtpu: 0.0.40
codegen_flags: <defaults>
</compile_context>

<pallas_src>
import numpy as np
import jax
import jax.numpy as jnp
from jax.experimental import pallas as pl
from jax.experimental.pallas import tpu as pltpu

# ---- synthetic hyper-parameters (small, consistent with the module) ----
B = 2            # batch
L = 16           # hyper.max_text_len
E = 16           # hyper.emb_size
H = 32           # hyper.hidden_size
BIO_EMB = 8      # hyper.bio_emb_size
REL = 8          # hyper.rel_emb_size
NBIO = 4         # len(bio_vocab)  ('B', 'I', 'O', '<pad>')
NB = NBIO - 1    # CRF / emission tag count
R = 7            # len(relation_vocab)
VOCAB = 50       # len(word_vocab)
PAD_ID = 0       # word_vocab['<pad>']
HC = H + BIO_EMB


# ----------------------------------------------------------------------------------------------
# Pallas kernel: fused emission + multi-head selection head + masked BCE reduction (per batch)
# ----------------------------------------------------------------------------------------------
def _selection_kernel(oc_ref, gold_ref, pmask_ref,
                      wfused_ref, sproj_ref, tproj_ref,
                      wblk_ref, s4f_ref, t4f_ref, relw_ref,
                      emi_ref, logits_ref, loss_ref):
    l = oc_ref.shape[1]
    rel = relw_ref.shape[1]

    oc = oc_ref[0]                                                  # (L, HC)

    # one fused matmul: columns [0:REL]=selection_u, [REL:2REL]=selection_v, [2REL:]=emission
    # linear biases + eval-mode BatchNorm1d affines are folded into sproj / tproj host-side.
    proj = jnp.dot(oc, wfused_ref[...], preferred_element_type=jnp.float32)
    proj = jnp.maximum(proj * sproj_ref[...] + tproj_ref[...], 0.0)  # (L, 2*REL+NB)

    emi_ref[0] = proj[:, 2 * rel:]                                  # CRF emissions (L, NB)

    # [a_j | b_i] = [su | sv] @ blockdiag(Wuv_u, Wuv_v)  (one small matmul)
    suv = proj[:, :2 * rel]                                         # (L, 2*REL)
    ab = jnp.dot(suv, wblk_ref[...], preferred_element_type=jnp.float32)
    a_j = ab[:, :rel]                                               # (L, REL), indexed by j
    b_i = ab[:, rel:]                                               # (L, REL), indexed by i

    # uv for every (i, j) pair at once: rows ordered i*L + j.
    # BN4 (channel = i, eps = L quirk) and buv are folded into s4f / t4f host-side.
    uv = (b_i[:, None, :] + a_j[None, :, :]).reshape(l * l, rel)    # (L*L, REL)
    uv = jnp.maximum(uv * s4f_ref[...] + t4f_ref[...], 0.0)

    # logits[r, i*L+j] = sum_h uv[i*L+j, h] * relw[r, h]   (single MXU op, lane-dense store)
    lg = jax.lax.dot_general(relw_ref[...], uv, (((1,), (1,)), ((), ())),
                             preferred_element_type=jnp.float32)    # (R, L*L)
    logits_ref[0] = lg

    # masked BCE-with-logits, vectorized over (i, r, j)
    y = gold_ref[0].astype(jnp.float32)                             # (R, L*L)
    w = pmask_ref[0]                                                # (1, L*L): mask[i]*mask[j]
    bce = jnp.maximum(lg, 0.0) - lg * y + jnp.log(1.0 + jnp.exp(-jnp.abs(lg)))
    loss = jnp.sum(bce * w)
    loss_ref[0] = jnp.zeros((1, 128), jnp.float32) + loss           # single lane-dense row


def _bn_affine(bn, eps):
    # eval-mode BatchNorm folded into per-channel scale/shift, channel = sequence position
    s = bn['gamma'] / jnp.sqrt(bn['var'] + eps)
    t = bn['beta'] - bn['mean'] * s
    return s.reshape(-1, 1).astype(jnp.float32), t.reshape(-1, 1).astype(jnp.float32)


def selection_head_pallas(o_cat, maskf, selection_gold, params):
    b, l, hc = o_cat.shape
    h, nb = params['We'].shape
    r, rel = params['rel_emb'].shape

    s1, t1 = _bn_affine(params['bn1'], 1e-5)
    s2, t2 = _bn_affine(params['bn2'], 1e-5)
    s3, t3 = _bn_affine(params['bn3'], 1e-5)
    s4, t4 = _bn_affine(params['bn4'], float(l))   # nn.BatchNorm2d(L, L): eps == max_text_len

    # fused projection weight [Wu | Wv | We_pad]  (emission reads the first H cols of o_cat)
    we_pad = jnp.concatenate([params['We'], jnp.zeros((hc - h, nb), jnp.float32)], axis=0)
    w_fused = jnp.concatenate([params['Wu'], params['Wv'], we_pad], axis=1)        # (HC, 19)

    # per-position BN scale/shift with linear biases folded in
    s_proj = jnp.concatenate([jnp.broadcast_to(s2, (l, rel)),
                              jnp.broadcast_to(s3, (l, rel)),
                              jnp.broadcast_to(s1, (l, nb))], axis=1)              # (L, 19)
    t_proj = jnp.concatenate([params['bu'][None, :] * s2 + t2,
                              params['bv'][None, :] * s3 + t3,
                              params['be'][None, :] * s1 + t1], axis=1)            # (L, 19)

    # block-diagonal second projection: [a_j | b_i] = [su | sv] @ blockdiag(Wuv_u, Wuv_v)
    wuv_u = params['Wuv'][:rel, :]
    wuv_v = params['Wuv'][rel:, :]
    zero = jnp.zeros((rel, rel), jnp.float32)
    w_blk = jnp.concatenate([jnp.concatenate([wuv_u, zero], axis=1),
                             jnp.concatenate([zero, wuv_v], axis=1)], axis=0)      # (16, 16)

    # BN4 affine (channel = i) with buv folded in, flattened over (i, j) rows
    s4_flat = jnp.repeat(s4, l, axis=0)                                            # (L*L, 1)
    t4_flat = jnp.repeat(params['buv'][None, :] * s4 + t4, l, axis=0)              # (L*L, REL)

    # gold in (b, r, i*L+j) layout, bf16 (exact for 0/1); pair mask mask[i]*mask[j]
    gold_k = jnp.transpose(selection_gold, (0, 2, 1, 3)).reshape(b, r, l * l)
    gold_k = gold_k.astype(jnp.bfloat16)
    pair_mask = (maskf[:, :, None] * maskf[:, None, :]).reshape(b, 1, l * l)
    pair_mask = pair_mask.astype(jnp.float32)

    ins = [
        o_cat.astype(jnp.float32),
        gold_k,
        pair_mask,
        w_fused, s_proj, t_proj,
        w_blk, s4_flat, t4_flat,
        params['rel_emb'].astype(jnp.float32),
    ]

    def whole(arr):  # replicated operand: full-array block every grid step
        nd = arr.ndim
        return pl.BlockSpec(arr.shape, lambda bb, _nd=nd: (0,) * _nd)

    in_specs = [
        pl.BlockSpec((1, l, hc), lambda bb: (bb, 0, 0)),
        pl.BlockSpec((1, r, l * l), lambda bb: (bb, 0, 0)),
        pl.BlockSpec((1, 1, l * l), lambda bb: (bb, 0, 0)),
    ] + [whole(a) for a in ins[3:]]

    out_shape = (
        jax.ShapeDtypeStruct((b, l, nb), jnp.float32),       # emissions
        jax.ShapeDtypeStruct((b, r, l * l), jnp.float32),    # logits, (r, i*L+j) lane-dense
        jax.ShapeDtypeStruct((b, 1, 128), jnp.float32),      # per-batch masked BCE sum
    )
    out_specs = (
        pl.BlockSpec((1, l, nb), lambda bb: (bb, 0, 0)),
        pl.BlockSpec((1, r, l * l), lambda bb: (bb, 0, 0)),
        pl.BlockSpec((1, 1, 128), lambda bb: (bb, 0, 0)),
    )

    emissions, logits_flat, loss_rows = pl.pallas_call(
        _selection_kernel,
        grid=(b,),
        in_specs=in_specs,
        out_specs=out_specs,
        out_shape=out_shape,
        compiler_params=pltpu.CompilerParams(dimension_semantics=("parallel",)),
    )(*ins)

    # (b, r, i, j) -> torch 'birj' layout (layout plumbing outside the kernel)
    sel_logits = jnp.transpose(logits_flat.reshape(b, r, l, l), (0, 2, 1, 3))
    return emissions, sel_logits, loss_rows[:, 0, 0]


# ----------------------------------------------------------------------------------------------
# plain-JAX pieces (recurrences): bidirectional GRU encoder, CRF negative log-likelihood
# ----------------------------------------------------------------------------------------------
def gru_layer(x, p, reverse=False):
    w_ih, w_hh, b_ih, b_hh = p['w_ih'], p['w_hh'], p['b_ih'], p['b_hh']
    hd = w_hh.shape[1]

    def cell(hprev, x_t):
        gi = x_t @ w_ih.T + b_ih
        gh = hprev @ w_hh.T + b_hh
        i_r, i_z, i_n = jnp.split(gi, 3, axis=-1)
        h_r, h_z, h_n = jnp.split(gh, 3, axis=-1)
        rg = jax.nn.sigmoid(i_r + h_r)
        zg = jax.nn.sigmoid(i_z + h_z)
        ng = jnp.tanh(i_n + rg * h_n)
        hnew = (1.0 - zg) * ng + zg * hprev
        return hnew, hnew

    xs = jnp.swapaxes(x, 0, 1)
    if reverse:
        xs = xs[::-1]
    h0 = jnp.zeros((x.shape[0], hd), x.dtype)
    _, ys = jax.lax.scan(cell, h0, xs)
    if reverse:
        ys = ys[::-1]
    return jnp.swapaxes(ys, 0, 1)


def crf_nll(emissions, tags, maskf, start, end, trans):
    # torchcrf CRF(batch_first=True), reduction='mean'  ->  returns -llh.mean()
    b, l, t = emissions.shape
    barange = jnp.arange(b)
    first = tags[:, 0]
    score = start[first] + emissions[barange, 0, first]
    for step in range(1, l):
        cur = tags[:, step]
        prev = tags[:, step - 1]
        score = score + (trans[prev, cur] + emissions[barange, step, cur]) * maskf[:, step]
    last_idx = jnp.sum(maskf, axis=1).astype(jnp.int32) - 1
    last_tags = tags[barange, last_idx]
    score = score + end[last_tags]
    # partition function (forward algorithm)
    alpha = start[None, :] + emissions[:, 0]
    for step in range(1, l):
        nxt = jax.scipy.special.logsumexp(
            alpha[:, :, None] + trans[None, :, :] + emissions[:, step][:, None, :], axis=1)
        alpha = jnp.where(maskf[:, step][:, None] > 0, nxt, alpha)
    logz = jax.scipy.special.logsumexp(alpha + end[None, :], axis=1)
    return -jnp.mean(score - logz)


# ----------------------------------------------------------------------------------------------
# full forward (train path)
# ----------------------------------------------------------------------------------------------
def forward(params, tokens, bio_gold, selection_gold):
    mask = tokens != PAD_ID
    maskf = mask.astype(jnp.float32)
    embedded = params['word_emb'][tokens]                            # (B, L, E)
    o_f = gru_layer(embedded, params['gru_fwd'], reverse=False)
    o_b = gru_layer(embedded, params['gru_bwd'], reverse=True)
    o = (o_f + o_b) * 0.5                                            # sum(split(o, H, dim=2)) / 2
    tag_emb = params['bio_emb'][bio_gold]                            # (B, L, BIO_EMB)
    o_cat = jnp.concatenate([o, tag_emb], axis=2)                    # (B, L, H+BIO_EMB)

    emissions, selection_logits, bce_sums = selection_head_pallas(
        o_cat, maskf, selection_gold, params)

    selection_loss = jnp.sum(bce_sums) / jnp.sum(maskf)
    crf_loss = crf_nll(emissions, bio_gold, maskf,
                       params['crf_start'], params['crf_end'], params['crf_trans'])
    loss = 2.0 * crf_loss + selection_loss
    return {'emissions': emissions, 'selection_logits': selection_logits, 'o_cat': o_cat,
            'maskf': maskf, 'crf_loss': crf_loss, 'selection_loss': selection_loss, 'loss': loss}


# ----------------------------------------------------------------------------------------------
# deterministic parameter init + pure-JAX reference of the selection head (for validation)
# ----------------------------------------------------------------------------------------------
def init_params(key):
    keys = iter(jax.random.split(key, 64))

    def nrm(shape, scale=0.1):
        return scale * jax.random.normal(next(keys), shape, jnp.float32)

    def bn(n):
        return {'gamma': 1.0 + nrm((n,)), 'beta': nrm((n,)),
                'mean': nrm((n,)), 'var': 1.0 + 0.1 * jax.random.uniform(next(keys), (n,))}

    p = {
        'word_emb': nrm((VOCAB, E), 0.5),
        'bio_emb': nrm((NBIO, BIO_EMB), 0.5),
        'rel_emb': nrm((R, REL), 0.5),
        'We': nrm((H, NB)), 'be': nrm((NB,)),
        'Wu': nrm((HC, REL)), 'bu': nrm((REL,)),
        'Wv': nrm((HC, REL)), 'bv': nrm((REL,)),
        'Wuv': nrm((2 * REL, REL)), 'buv': nrm((REL,)),
        'crf_start': nrm((NB,)), 'crf_end': nrm((NB,)), 'crf_trans': nrm((NB, NB)),
    }
    for d in ('fwd', 'bwd'):
        p[f'gru_{d}'] = {'w_ih': nrm((3 * H, E)), 'w_hh': nrm((3 * H, H)),
                         'b_ih': nrm((3 * H,)), 'b_hh': nrm((3 * H,))}
    for name in ('bn1', 'bn2', 'bn3', 'bn4'):
        p[name] = bn(L)
    return p


def reference_selection(params, o_cat, maskf, selection_gold):
    s2, t2 = _bn_affine(params['bn2'], 1e-5)
    s3, t3 = _bn_affine(params['bn3'], 1e-5)
    s4, t4 = _bn_affine(params['bn4'], float(L))
    su = jnp.maximum((o_cat @ params['Wu'] + params['bu']) * s2[None] + t2[None], 0.0)
    sv = jnp.maximum((o_cat @ params['Wv'] + params['bv']) * s3[None] + t3[None], 0.0)
    u = jnp.broadcast_to(su[:, None, :, :], (B, L, L, REL))
    v = jnp.broadcast_to(sv[:, :, None, :], (B, L, L, REL))
    uv = jnp.concatenate([u, v], axis=-1) @ params['Wuv'] + params['buv']
    uv = jnp.maximum(uv * s4.reshape(1, L, 1, 1) + t4.reshape(1, L, 1, 1), 0.0)
    logits = jnp.einsum('bijh,rh->birj', uv, params['rel_emb'])
    bce = jnp.maximum(logits, 0.0) - logits * selection_gold + jnp.log1p(jnp.exp(-jnp.abs(logits)))
    selmask = maskf[:, :, None, None] * maskf[:, None, None, :]
    sel_loss = jnp.sum(bce * selmask) / jnp.sum(maskf)
    return logits, sel_loss


def reference_emission(params, o_cat):
    s1, t1 = _bn_affine(params['bn1'], 1e-5)
    o = o_cat[:, :, :H]
    return jnp.maximum((o @ params['We'] + params['be']) * s1[None] + t1[None], 0.0)


if __name__ == "__main__":
    root = jax.random.PRNGKey(0)
    k_params, k_tok, k_bio, k_gold = jax.random.split(root, 4)
    params = init_params(k_params)

    lengths = jnp.array([L, 10], dtype=jnp.int32)                    # first position always valid
    tokens = jax.random.randint(k_tok, (B, L), 1, VOCAB)
    tokens = jnp.where(jnp.arange(L)[None, :] < lengths[:, None], tokens, PAD_ID)
    bio_gold = jax.random.randint(k_bio, (B, L), 0, NB)              # valid CRF tags everywhere
    selection_gold = (jax.random.uniform(k_gold, (B, L, R, L)) < 0.1).astype(jnp.float32)

    out = jax.jit(forward)(params, tokens, bio_gold, selection_gold)
    jax.block_until_ready(out['loss'])

    # validate the Pallas selection head against a pure-JAX reference
    ref_logits, ref_sel_loss = reference_selection(params, out['o_cat'], out['maskf'],
                                                   selection_gold)
    ref_emi = reference_emission(params, out['o_cat'])
    np.testing.assert_allclose(np.asarray(out['selection_logits']), np.asarray(ref_logits),
                               rtol=2e-2, atol=2e-2)
    np.testing.assert_allclose(float(out['selection_loss']), float(ref_sel_loss),
                               rtol=2e-2, atol=2e-2)
    np.testing.assert_allclose(np.asarray(out['emissions']), np.asarray(ref_emi),
                               rtol=2e-2, atol=2e-2)

    assert out['selection_logits'].shape == (B, L, R, L)
    assert out['emissions'].shape == (B, L, NB)
    assert np.isfinite(float(out['loss']))
    print("KERNEL_OK")
</pallas_src>

<mosaic_0001>
module attributes {stable_mosaic.version = 11 : i64} {
  func.func @_selection_kernel(%arg0: i32, %arg1: memref<1x16x40xf32, #tpu.memory_space<vmem>>, %arg2: memref<1x7x256xbf16, #tpu.memory_space<vmem>>, %arg3: memref<1x1x256xf32, #tpu.memory_space<vmem>>, %arg4: memref<40x19xf32, #tpu.memory_space<vmem>>, %arg5: memref<16x19xf32, #tpu.memory_space<vmem>>, %arg6: memref<16x19xf32, #tpu.memory_space<vmem>>, %arg7: memref<16x16xf32, #tpu.memory_space<vmem>>, %arg8: memref<256x1xf32, #tpu.memory_space<vmem>>, %arg9: memref<256x8xf32, #tpu.memory_space<vmem>>, %arg10: memref<7x8xf32, #tpu.memory_space<vmem>>, %arg11: memref<1x16x3xf32, #tpu.memory_space<vmem>>, %arg12: memref<1x7x256xf32, #tpu.memory_space<vmem>>, %arg13: memref<1x1x128xf32, #tpu.memory_space<vmem>>) attributes {dimension_semantics = [#tpu.dimension_semantics<parallel>], iteration_bounds = array<i64: 2>, scalar_prefetch = 0 : i64, scratch_operands = 0 : i64, tpu.core_type = #tpu.core_type<tc>, window_params = [{transform_indices = @transform_0, window_bounds = array<i64: 1, 16, 40>}, {transform_indices = @transform_1, window_bounds = array<i64: 1, 7, 256>}, {transform_indices = @transform_2, window_bounds = array<i64: 1, 1, 256>}, {pipeline_mode = #tpu.pipeline_mode<synchronous>, transform_indices = @transform_3, window_bounds = array<i64: 40, 19>}, {pipeline_mode = #tpu.pipeline_mode<synchronous>, transform_indices = @transform_4, window_bounds = array<i64: 16, 19>}, {pipeline_mode = #tpu.pipeline_mode<synchronous>, transform_indices = @transform_5, window_bounds = array<i64: 16, 19>}, {pipeline_mode = #tpu.pipeline_mode<synchronous>, transform_indices = @transform_6, window_bounds = array<i64: 16, 16>}, {pipeline_mode = #tpu.pipeline_mode<synchronous>, transform_indices = @transform_7, window_bounds = array<i64: 256, 1>}, {pipeline_mode = #tpu.pipeline_mode<synchronous>, transform_indices = @transform_8, window_bounds = array<i64: 256, 8>}, {pipeline_mode = #tpu.pipeline_mode<synchronous>, transform_indices = @transform_9, window_bounds = array<i64: 7, 8>}, {transform_indices = @transform_10, window_bounds = array<i64: 1, 16, 3>}, {transform_indices = @transform_11, window_bounds = array<i64: 1, 7, 256>}, {transform_indices = @transform_12, window_bounds = array<i64: 1, 1, 128>}]} {
    %c0 = arith.constant 0 : index
    %c0_0 = arith.constant 0 : index
    %c0_1 = arith.constant 0 : index
    %0 = vector.load %arg1[%c0, %c0_0, %c0_1] : memref<1x16x40xf32, #tpu.memory_space<vmem>>, vector<1x16x40xf32>
    %1 = vector.shape_cast %0 : vector<1x16x40xf32> to vector<16x40xf32>
    %c0_2 = arith.constant 0 : index
    %c0_3 = arith.constant 0 : index
    %2 = vector.load %arg4[%c0_2, %c0_3] : memref<40x19xf32, #tpu.memory_space<vmem>>, vector<40x19xf32>
    %cst = arith.constant dense<0.000000e+00> : vector<16x19xf32>
    %3 = tpu.matmul %1, %2, %cst {dimension_numbers = #tpu.dot_dimension_numbers<[1], [0], [0], [1], [0, 0, 1, 1], [], []>} : vector<16x40xf32>, vector<40x19xf32>, vector<16x19xf32> -> vector<16x19xf32>
    %c0_4 = arith.constant 0 : index
    %c0_5 = arith.constant 0 : index
    %4 = vector.load %arg5[%c0_4, %c0_5] : memref<16x19xf32, #tpu.memory_space<vmem>>, vector<16x19xf32>
    %5 = arith.mulf %3, %4 : vector<16x19xf32>
    %c0_6 = arith.constant 0 : index
    %c0_7 = arith.constant 0 : index
    %6 = vector.load %arg6[%c0_6, %c0_7] : memref<16x19xf32, #tpu.memory_space<vmem>>, vector<16x19xf32>
    %7 = arith.addf %5, %6 : vector<16x19xf32>
    %cst_8 = arith.constant 0.000000e+00 : f32
    %8 = vector.broadcast %cst_8 : f32 to vector<16x19xf32>
    %9 = arith.maximumf %7, %8 : vector<16x19xf32>
    %10 = vector.extract_strided_slice %9 {offsets = [0, 16], sizes = [16, 3], strides = [1, 1]} : vector<16x19xf32> to vector<16x3xf32>
    %c0_9 = arith.constant 0 : index
    %c0_10 = arith.constant 0 : index
    %c0_11 = arith.constant 0 : index
    %11 = vector.load %arg11[%c0_9, %c0_10, %c0_11] : memref<1x16x3xf32, #tpu.memory_space<vmem>>, vector<1x16x3xf32>
    %12 = vector.shape_cast %11 : vector<1x16x3xf32> to vector<16x3xf32>
    %13 = vector.shape_cast %10 : vector<16x3xf32> to vector<1x16x3xf32>
    tpu.vector_store %arg11[%c0_9, %c0_10, %c0_11], %13 {strides = array<i32>} : memref<1x16x3xf32, #tpu.memory_space<vmem>>, vector<1x16x3xf32>,
    %14 = vector.extract_strided_slice %9 {offsets = [0, 0], sizes = [16, 16], strides = [1, 1]} : vector<16x19xf32> to vector<16x16xf32>
    %c0_12 = arith.constant 0 : index
    %c0_13 = arith.constant 0 : index
    %15 = vector.load %arg7[%c0_12, %c0_13] : memref<16x16xf32, #tpu.memory_space<vmem>>, vector<16x16xf32>
    %cst_14 = arith.constant dense<0.000000e+00> : vector<16x16xf32>
    %16 = tpu.matmul %14, %15, %cst_14 {dimension_numbers = #tpu.dot_dimension_numbers<[1], [0], [0], [1], [0, 0, 1, 1], [], []>} : vector<16x16xf32>, vector<16x16xf32>, vector<16x16xf32> -> vector<16x16xf32>
    %17 = vector.extract_strided_slice %16 {offsets = [0, 0], sizes = [16, 8], strides = [1, 1]} : vector<16x16xf32> to vector<16x8xf32>
    %18 = vector.extract_strided_slice %16 {offsets = [0, 8], sizes = [16, 8], strides = [1, 1]} : vector<16x16xf32> to vector<16x8xf32>
    %19 = vector.shape_cast %18 : vector<16x8xf32> to vector<16x1x8xf32>
    %20 = vector.shape_cast %17 : vector<16x8xf32> to vector<1x16x8xf32>
    %21 = vector.broadcast %19 : vector<16x1x8xf32> to vector<16x16x8xf32>
    %22 = vector.broadcast %20 : vector<1x16x8xf32> to vector<16x16x8xf32>
    %23 = arith.addf %21, %22 : vector<16x16x8xf32>
    %24 = vector.shape_cast %23 : vector<16x16x8xf32> to vector<256x8xf32>
    %c0_15 = arith.constant 0 : index
    %c0_16 = arith.constant 0 : index
    %25 = vector.load %arg8[%c0_15, %c0_16] : memref<256x1xf32, #tpu.memory_space<vmem>>, vector<256x1xf32>
    %26 = vector.broadcast %25 : vector<256x1xf32> to vector<256x8xf32>
    %27 = arith.mulf %24, %26 : vector<256x8xf32>
    %c0_17 = arith.constant 0 : index
    %c0_18 = arith.constant 0 : index
    %28 = vector.load %arg9[%c0_17, %c0_18] : memref<256x8xf32, #tpu.memory_space<vmem>>, vector<256x8xf32>
    %29 = arith.addf %27, %28 : vector<256x8xf32>
    %cst_19 = arith.constant 0.000000e+00 : f32
    %30 = vector.broadcast %cst_19 : f32 to vector<256x8xf32>
    %31 = arith.maximumf %29, %30 : vector<256x8xf32>
    %c0_20 = arith.constant 0 : index
    %c0_21 = arith.constant 0 : index
    %32 = vector.load %arg10[%c0_20, %c0_21] : memref<7x8xf32, #tpu.memory_space<vmem>>, vector<7x8xf32>
    %cst_22 = arith.constant dense<0.000000e+00> : vector<7x256xf32>
    %33 = tpu.matmul %32, %31, %cst_22 {dimension_numbers = #tpu.dot_dimension_numbers<[1], [1], [0], [0], [0, 0, 1, 0], [], []>} : vector<7x8xf32>, vector<256x8xf32>, vector<7x256xf32> -> vector<7x256xf32>
    %c0_23 = arith.constant 0 : index
    %c0_24 = arith.constant 0 : index
    %c0_25 = arith.constant 0 : index
    %34 = vector.load %arg12[%c0_23, %c0_24, %c0_25] : memref<1x7x256xf32, #tpu.memory_space<vmem>>, vector<1x7x256xf32>
    %35 = vector.shape_cast %34 : vector<1x7x256xf32> to vector<7x256xf32>
    %36 = vector.shape_cast %33 : vector<7x256xf32> to vector<1x7x256xf32>
    tpu.vector_store %arg12[%c0_23, %c0_24, %c0_25], %36 {strides = array<i32>} : memref<1x7x256xf32, #tpu.memory_space<vmem>>, vector<1x7x256xf32>,
    %c0_26 = arith.constant 0 : index
    %c0_27 = arith.constant 0 : index
    %c0_28 = arith.constant 0 : index
    %37 = vector.load %arg2[%c0_26, %c0_27, %c0_28] : memref<1x7x256xbf16, #tpu.memory_space<vmem>>, vector<1x7x256xbf16>
    %38 = vector.shape_cast %37 : vector<1x7x256xbf16> to vector<7x256xbf16>
    %39 = arith.extf %38 : vector<7x256xbf16> to vector<7x256xf32>
    %c0_29 = arith.constant 0 : index
    %c0_30 = arith.constant 0 : index
    %c0_31 = arith.constant 0 : index
    %40 = vector.load %arg3[%c0_29, %c0_30, %c0_31] : memref<1x1x256xf32, #tpu.memory_space<vmem>>, vector<1x1x256xf32>
    %41 = vector.shape_cast %40 : vector<1x1x256xf32> to vector<1x256xf32>
    %cst_32 = arith.constant 0.000000e+00 : f32
    %42 = vector.broadcast %cst_32 : f32 to vector<7x256xf32>
    %43 = arith.maximumf %33, %42 : vector<7x256xf32>
    %44 = arith.mulf %33, %39 : vector<7x256xf32>
    %45 = arith.subf %43, %44 : vector<7x256xf32>
    %46 = math.absf %33 : vector<7x256xf32>
    %cst_33 = arith.constant 0.000000e+00 : f32
    %47 = vector.broadcast %cst_33 : f32 to vector<7x256xf32>
    %48 = arith.subf %47, %46 : vector<7x256xf32>
    %49 = math.exp %48 : vector<7x256xf32>
    %cst_34 = arith.constant 1.000000e+00 : f32
    %50 = vector.broadcast %cst_34 : f32 to vector<7x256xf32>
    %51 = arith.addf %50, %49 : vector<7x256xf32>
    %52 = math.log %51 : vector<7x256xf32>
    %53 = arith.addf %45, %52 : vector<7x256xf32>
    %54 = vector.broadcast %41 : vector<1x256xf32> to vector<7x256xf32>
    %55 = arith.mulf %53, %54 : vector<7x256xf32>
    %56 = vector.shape_cast %55 : vector<7x256xf32> to vector<1x7x256xf32>
    %cst_35 = arith.constant dense<0.000000e+00> : vector<1xf32>
    %57 = vector.multi_reduction <add>, %56, %cst_35 [1, 2] : vector<1x7x256xf32> to vector<1xf32>
    %58 = vector.shape_cast %57 : vector<1xf32> to vector<1x1x1xf32>
    %59 = vector.extract %58[0, 0, 0] : f32 from vector<1x1x1xf32>
    %cst_36 = arith.constant 0.000000e+00 : f32
    %60 = vector.broadcast %cst_36 : f32 to vector<1x128xf32>
    %61 = vector.broadcast %59 : f32 to vector<1x128xf32>
    %62 = arith.addf %60, %61 : vector<1x128xf32>
    %c0_37 = arith.constant 0 : index
    %c0_38 = arith.constant 0 : index
    %c0_39 = arith.constant 0 : index
    %63 = vector.load %arg13[%c0_37, %c0_38, %c0_39] : memref<1x1x128xf32, #tpu.memory_space<vmem>>, vector<1x1x128xf32>
    %64 = vector.shape_cast %63 : vector<1x1x128xf32> to vector<1x128xf32>
    %65 = vector.shape_cast %62 : vector<1x128xf32> to vector<1x1x128xf32>
    tpu.vector_store %arg13[%c0_37, %c0_38, %c0_39], %65 {strides = array<i32>} : memref<1x1x128xf32, #tpu.memory_space<vmem>>, vector<1x1x128xf32>,
    return
  }
  func.func @transform_0(%arg0: i32) -> (i32, i32, i32) {
    %c0_i32 = arith.constant 0 : i32
    %c0_i32_0 = arith.constant 0 : i32
    %c0_i32_1 = arith.constant 0 : i32
    return %arg0, %c0_i32, %c0_i32_0 : i32, i32, i32
  }
  func.func @transform_1(%arg0: i32) -> (i32, i32, i32) {
    %c0_i32 = arith.constant 0 : i32
    %c0_i32_0 = arith.constant 0 : i32
    %c0_i32_1 = arith.constant 0 : i32
    return %arg0, %c0_i32, %c0_i32_0 : i32, i32, i32
  }
  func.func @transform_2(%arg0: i32) -> (i32, i32, i32) {
    %c0_i32 = arith.constant 0 : i32
    %c0_i32_0 = arith.constant 0 : i32
    %c0_i32_1 = arith.constant 0 : i32
    return %arg0, %c0_i32, %c0_i32_0 : i32, i32, i32
  }
  func.func @transform_3(%arg0: i32) -> (i32, i32) {
    %c0_i32 = arith.constant 0 : i32
    %c0_i32_0 = arith.constant 0 : i32
    %c0_i32_1 = arith.constant 0 : i32
    return %c0_i32, %c0_i32_0 : i32, i32
  }
  func.func @transform_4(%arg0: i32) -> (i32, i32) {
    %c0_i32 = arith.constant 0 : i32
    %c0_i32_0 = arith.constant 0 : i32
    %c0_i32_1 = arith.constant 0 : i32
    return %c0_i32, %c0_i32_0 : i32, i32
  }
  func.func @transform_5(%arg0: i32) -> (i32, i32) {
    %c0_i32 = arith.constant 0 : i32
    %c0_i32_0 = arith.constant 0 : i32
    %c0_i32_1 = arith.constant 0 : i32
    return %c0_i32, %c0_i32_0 : i32, i32
  }
  func.func @transform_6(%arg0: i32) -> (i32, i32) {
    %c0_i32 = arith.constant 0 : i32
    %c0_i32_0 = arith.constant 0 : i32
    %c0_i32_1 = arith.constant 0 : i32
    return %c0_i32, %c0_i32_0 : i32, i32
  }
  func.func @transform_7(%arg0: i32) -> (i32, i32) {
    %c0_i32 = arith.constant 0 : i32
    %c0_i32_0 = arith.constant 0 : i32
    %c0_i32_1 = arith.constant 0 : i32
    return %c0_i32, %c0_i32_0 : i32, i32
  }
  func.func @transform_8(%arg0: i32) -> (i32, i32) {
    %c0_i32 = arith.constant 0 : i32
    %c0_i32_0 = arith.constant 0 : i32
    %c0_i32_1 = arith.constant 0 : i32
    return %c0_i32, %c0_i32_0 : i32, i32
  }
  func.func @transform_9(%arg0: i32) -> (i32, i32) {
    %c0_i32 = arith.constant 0 : i32
    %c0_i32_0 = arith.constant 0 : i32
    %c0_i32_1 = arith.constant 0 : i32
    return %c0_i32, %c0_i32_0 : i32, i32
  }
  func.func @transform_10(%arg0: i32) -> (i32, i32, i32) {
    %c0_i32 = arith.constant 0 : i32
    %c0_i32_0 = arith.constant 0 : i32
    %c0_i32_1 = arith.constant 0 : i32
    return %arg0, %c0_i32, %c0_i32_0 : i32, i32, i32
  }
  func.func @transform_11(%arg0: i32) -> (i32, i32, i32) {
    %c0_i32 = arith.constant 0 : i32
    %c0_i32_0 = arith.constant 0 : i32
    %c0_i32_1 = arith.constant 0 : i32
    return %arg0, %c0_i32, %c0_i32_0 : i32, i32, i32
  }
  func.func @transform_12(%arg0: i32) -> (i32, i32, i32) {
    %c0_i32 = arith.constant 0 : i32
    %c0_i32_0 = arith.constant 0 : i32
    %c0_i32_1 = arith.constant 0 : i32
    return %arg0, %c0_i32, %c0_i32_0 : i32, i32, i32
  }
}

</mosaic_0001>

<bundles_post_ra>
// kernel: custom-call.64
= control target key start
LH: loop header
LB: loop body
LE: loop exit
PB: predicated region body
PF: predicated region fallthrough
CT: control target
= control target key end

     0   :  { %s6_s0 = inlined_call_operand.vmem [shape: f32[2,32], index: 0, kind: output, shape index: {}]  }

// kernel: forward.1
= control target key start
LH: loop header
LB: loop body
LE: loop exit
PB: predicated region body
PF: predicated region fallthrough
CT: control target
= control target key end

     0   :  { %s2125_s21 = smov 0   ;;  %s2729_s0 = inlined_call_operand.vmem [shape: f32[2,16,40], index: 0, kind: input, shape index: {}]   ;;  %s2730_s1 = inlined_call_operand.vmem [shape: bf16[2,7,256], index: 1, kind: input, shape index: {}]   ;;  %s2731_s2 = inlined_call_operand.vmem [shape: f32[2,1,256], index: 2, kind: input, shape index: {}]   ;;  %s2732_s3 = inlined_call_operand.vmem [shape: f32[40,19], index: 3, kind: input, shape index: {}]   ;;  %s2733_s4 = inlined_call_operand.vmem [shape: f32[16,19], index: 4, kind: input, shape index: {}]   ;;  %s2734_s5 = inlined_call_operand.vmem [shape: f32[16,19], index: 5, kind: input, shape index: {}]   ;;  %s2735_s6 = inlined_call_operand.vmem [shape: f32[16,16], index: 6, kind: input, shape index: {}]   ;;  %s2736_s7 = inlined_call_operand.vmem [shape: f32[256,1], index: 7, kind: input, shape index: {}]   ;;  %s2737_s8 = inlined_call_operand.vmem [shape: f32[256,8], index: 8, kind: input, shape index: {}]   ;;  %s2738_s9 = inlined_call_operand.vmem [shape: f32[7,8], index: 9, kind: input, shape index: {}]   ;;  %s2739_s10 = inlined_call_operand.vmem [shape: f32[2,16,3], index: 10, kind: output, shape index: {0}]   ;;  %s2740_s11 = inlined_call_operand.vmem [shape: f32[2,7,256], index: 11, kind: output, shape index: {1}]   ;;  %s2741_s12 = inlined_call_operand.vmem [shape: f32[2,1,128], index: 12, kind: output, shape index: {2}]  }
   0x1 LB: > { %s1760_s22 = sadd.s32 4294967295, %s2053_s21   ;;  %p1764_p0 = scmp.ge.s32.totalorder %s2053_s21, 1  ;;  %s2053_s21 = sphi %s2125_s21, %s23_s21  }
   0x2   : > { %p386_p1 = scmp.lt.s32.totalorder %s2053_s21, 3 }
   0x4   : > { %p387_p2 = pnand %p1764_p0, %p386_p1 }
   0x5   : > { %v474_v0 = vld [vmem:[%s2732_s3] sm:$0xff] (!%p387_p2)  ;;  %v475_v1 = vld [vmem:[%s2732_s3 + $0x8] sm:$0xff] (!%p387_p2)  ;;  %v476_v2 = vld [vmem:[%s2732_s3 + $0x10] sm:$0xff] (!%p387_p2)  ;;  %p445_p3 = scmp.lt.s32.totalorder (!%p387_p2), %s1760_s22, 1  ;;  %vm479_vm0 = vcmask (!%p387_p2), 326656   ;;  %v2055_v14 = vmov (!%p387_p2), 0  }
   0x6   : > { %390 = sbr.rel (%p387_p2) target bundleno = 1232 (0x4d0), region = 60  ;;  %v1882_v3 = vpack.c.bf16 (!%p387_p2), %v475_v1, %v474_v0  ;;  %v477_v4 = vld [vmem:[%s2732_s3 + $0x18] sm:$0xff] (!%p387_p2)  ;;  %v478_v6 = vld [vmem:[%s2732_s3 + $0x20] sm:$0xff] (!%p387_p2)  ;;  %v583_v10 = vld [vmem:[%s2735_s6 + $0x8] sm:$0xff] (!%p387_p2)  ;;  %1957 = vset.pattern.permute.xlu0 (!%p387_p2), %v2055_v14  ;;  %1958 = vset.pattern.permute.xlu1 (!%p387_p2), %v2055_v14  ;;  %s2056_s30 = smov (!%p387_p2), 8   ;;  %vm584_vm1 = vcmask (!%p387_p2), 130048  }
   0x7   : > { %v1886_v5 = vpack.c.bf16 (!%p387_p2), %v477_v4, %v476_v2  ;;  %v582_v9 = vld [vmem:[%s2735_s6] sm:$0xff] (!%p387_p2)  ;;  %v899_v15 = vld [vmem:[%s2736_s7 + $0x88] sm:$0xff] (!%p387_p2)  ;;  %v900_v17 = vld [vmem:[%s2736_s7 + $0x90] sm:$0xff] (!%p387_p2)  ;;  %vm1427_vm2 = vcmask (!%p387_p2), 64512   ;;  %s2059_s20 = smov (!%p387_p2), 112   ;;  %vm579_vm4 = vcmask (!%p387_p2), 23552  }
   0x8   : > { %1883 = vmatprep.subr.bf16.mxu0 (!%p387_p2), %v1882_v3  ;;  %v1890_v11 = vpack.c.bf16 (!%p387_p2), %v583_v10, %v582_v9  ;;  %v898_v12 = vld [vmem:[%s2736_s7 + $0x80] sm:$0xff] (!%p387_p2)  ;;  %v883_v16 = vld [vmem:[%s2736_s7 + $0x8] sm:$0xff] (!%p387_p2)  ;;  %v901_v18 = vld [vmem:[%s2736_s7 + $0x98] sm:$0xff] (!%p387_p2)  ;;  %vm1607_vm5 = vcmask (!%p387_p2), 1046528  }
   0x9   : > { %1885 = vmatpush3.bf16.msra.mxu0 (!%p387_p2), %v1882_v3  ;;  %v882_v13 = vld [vmem:[%s2736_s7] sm:$0xff] (!%p387_p2)  ;;  %996 = vperm.xlu0 (!%p387_p2), %1957, %v898_v12   ;;  %v884_v19 = vld [vmem:[%s2736_s7 + $0x10] sm:$0xff] (!%p387_p2)  ;;  %v885_v20 = vld [vmem:[%s2736_s7 + $0x18] sm:$0xff] (!%p387_p2) }
   0xa   : > { %1887 = vmatprep.subr.bf16.mxu0 (!%p387_p2), %v1886_v5  ;;  %916 = vperm.xlu1 (!%p387_p2), %1958, %v882_v13   ;;  %v1122_v21 = vld [vmem:[%s2737_s8 + $0x80] sm:$0xff] (!%p387_p2)  ;;  %v1123_v22 = vld [vmem:[%s2737_s8 + $0x88] sm:$0xff] (!%p387_p2)  ;;  %v1124_v29 = vld [vmem:[%s2737_s8 + $0x90] sm:$0xff] (!%p387_p2) }
   0xb   : > { %v1106_v23 = vld [vmem:[%s2737_s8] sm:$0xff] (!%p387_p2)  ;;  %v1107_v24 = vld [vmem:[%s2737_s8 + $0x8] sm:$0xff] (!%p387_p2)  ;;  %v1125_v30 = vld [vmem:[%s2737_s8 + $0x98] sm:$0xff] (!%p387_p2) }
   0xc   : > { %v902_v25 = vld [vmem:[%s2736_s7 + $0xa0] sm:$0xff] (!%p387_p2)  ;;  %v903_v26 = vld [vmem:[%s2736_s7 + $0xa8] sm:$0xff] (!%p387_p2)  ;;  %v1108_v31 = vld [vmem:[%s2737_s8 + $0x10] sm:$0xff] (!%p387_p2) }
   0xd   : > { %s2749_s22 = smov (!%p445_p3, %s1760_s22), 1  ;;  %1889 = vmatpush3.bf16.msra.mxu0 %v1886_v5  ;;  %1001 = vperm.xlu0 %1957, %v899_v15   ;;  %v886_v27 = vld [vmem:[%s2736_s7 + $0x20] sm:$0xff]  ;;  %v887_v28 = vld [vmem:[%s2736_s7 + $0x28] sm:$0xff]  ;;  %v1109_v32 = vld [vmem:[%s2737_s8 + $0x18] sm:$0xff] }
   0xe   : > { %s2148_s13 = sshll.u32 %s2749_s22, 4  ;;  %1870 = vmatprep.subr.mxu0 %v478_v6  ;;  %921 = vperm.xlu1 %1958, %v883_v16   ;;  %v904_v33 = vld [vmem:[%s2736_s7 + $0xb0] sm:$0xff]  ;;  %v905_v34 = vld [vmem:[%s2736_s7 + $0xb8] sm:$0xff]  ;;  %v1126_v37 = vld [vmem:[%s2737_s8 + $0xa0] sm:$0xff]  ;;  %s1814_s29 = sshll.u32 %s2749_s22, 3 }
   0xf   : > { %s449_s16 = scalar_lea.vmem %s2729_s0, %s2148_s13  ;;  %v888_v35 = vld [vmem:[%s2736_s7 + $0x30] sm:$0xff]  ;;  %v889_v36 = vld [vmem:[%s2736_s7 + $0x38] sm:$0xff]  ;;  %v1127_v38 = vld [vmem:[%s2737_s8 + $0xa8] sm:$0xff]  ;;  %s463_s25 = scalar_lea.vmem %s2739_s10, %s2148_s13 }
  0x10   : > { %v472_v7 = vld [vmem:[%s449_s16] sm:$0xff]  ;;  %v473_v8 = vld [vmem:[%s449_s16 + $0x8] sm:$0xff]  ;;  %v1128_v45 = vld [vmem:[%s2737_s8 + $0xb0] sm:$0xff]  ;;  %s468_s28 = scalar_lea.vmem %s2740_s11, %s2148_s13  ;;  %s454_s16 = scalar_lea.vmem %s2730_s1, %s1814_s29 }
  0x11   : > { %1872 = vmatprep.mubr.msk.f32.mxu0 %vm479_vm0, %v472_v7  ;;  %1871 = vmatpush3.msra.mxu0 %v478_v6  ;;  %v1110_v39 = vld [vmem:[%s2737_s8 + $0x20] sm:$0xff]  ;;  %v1111_v40 = vld [vmem:[%s2737_s8 + $0x28] sm:$0xff]  ;;  %v1129_v60 = vld [vmem:[%s2737_s8 + $0xb8] sm:$0xff]  ;;  %s1769_s13 = sshll.u32 %s2749_s22, 1  ;;  %s471_s23 = scalar_lea.vmem %s2741_s12, %s2749_s22 }
  0x12   : > { %1873 = vmatmul.mubr.msk.f32.vlgmr.msra.gmra.mrb[0].mxu0 %vm479_vm0, %v473_v8  ;;  %1891 = vmatprep.subr.bf16.mxu0 %v1890_v11  ;;  %v906_v41 = vld [vmem:[%s2736_s7 + $0xc0] sm:$0xff]  ;;  %v907_v42 = vld [vmem:[%s2736_s7 + $0xc8] sm:$0xff]  ;;  %v1112_v61 = vld [vmem:[%s2737_s8 + $0x30] sm:$0xff]  ;;  %s458_s18 = scalar_lea.vmem %s2731_s2, %s1769_s13 }
  0x13   : > { %1893 = vmatpush3.bf16.msra.mxu0 %v1890_v11  ;;  %1006 = vperm.xlu0 %1957, %v900_v17   ;;  %v890_v43 = vld [vmem:[%s2736_s7 + $0x40] sm:$0xff]  ;;  %v891_v44 = vld [vmem:[%s2736_s7 + $0x48] sm:$0xff]  ;;  %v1113_v62 = vld [vmem:[%s2737_s8 + $0x38] sm:$0xff] }
  0x14   : > { %1011 = vperm.xlu1 %1958, %v901_v18   ;;  %v562_v46 = vld [vmem:[%s2733_s4 + $0x8] sm:$0xff]  ;;  %v561_v47 = vld [vmem:[%s2733_s4] sm:$0xff]  ;;  %v908_v63 = vld [vmem:[%s2736_s7 + $0xd0] sm:$0xff] }
  0x15   : > { %v566_v49 = vld [vmem:[%s2734_s5 + $0x8] sm:$0xff]  ;;  %v565_v52 = vld [vmem:[%s2734_s5] sm:$0xff]  ;;  %v909_v0 = vld [vmem:[%s2736_s7 + $0xd8] sm:$0xff] }
  0x16   : > { %v892_v1 = vld [vmem:[%s2736_s7 + $0x50] sm:$0xff]  ;;  %v893_v2 = vld [vmem:[%s2736_s7 + $0x58] sm:$0xff]  ;;  %v1130_v3 = vld [vmem:[%s2737_s8 + $0xc0] sm:$0xff] }
  0x17   : > { %926 = vperm.xlu0 %1957, %v884_v19   ;;  %v1131_v5 = vld [vmem:[%s2737_s8 + $0xc8] sm:$0xff]  ;;  %v1114_v6 = vld [vmem:[%s2737_s8 + $0x40] sm:$0xff]  ;;  %v1132_v16 = vld [vmem:[%s2737_s8 + $0xd0] sm:$0xff] }
  0x18   : > { %931 = vperm.xlu1 %1958, %v885_v20   ;;  %v1115_v9 = vld [vmem:[%s2737_s8 + $0x48] sm:$0xff]  ;;  %v910_v10 = vld [vmem:[%s2736_s7 + $0xe0] sm:$0xff]  ;;  %v1133_v19 = vld [vmem:[%s2737_s8 + $0xd8] sm:$0xff] }
  0x19   : > { %v911_v11 = vld [vmem:[%s2736_s7 + $0xe8] sm:$0xff]  ;;  %v894_v13 = vld [vmem:[%s2736_s7 + $0x60] sm:$0xff]  ;;  %v1116_v20 = vld [vmem:[%s2737_s8 + $0x50] sm:$0xff] }
  0x1a   : > { %v895_v15 = vld [vmem:[%s2736_s7 + $0x68] sm:$0xff]  ;;  %vm2666_vm3 = vmpackc.low %vm1427_vm2, %vm1427_vm2 }
  0x1b   : > { %1202 = vrot.lane.b32.xlu0 %v1122_v21, %s2056_s30  ;;  %v1117_v21 = vld [vmem:[%s2737_s8 + $0x58] sm:$0xff] }
  0x1c   : > { %1204 = vrot.lane.b32.xlu1 %v1123_v22, %s2056_s30 }
  0x1f   : > { %1170 = vrot.lane.b32.xlu0 %v1106_v23, %s2056_s30  ;;  %v912_v23 = vld [vmem:[%s2736_s7 + $0xf0] sm:$0xff] }
  0x20   : > { %1172 = vrot.lane.b32.xlu1 %v1107_v24, %s2056_s30 }
  0x23   : > { %1016 = vperm.xlu0 %1957, %v902_v25   ;;  %v913_v25 = vld [vmem:[%s2736_s7 + $0xf8] sm:$0xff] }
  0x24   : > { %1021 = vperm.xlu1 %1958, %v903_v26   ;;  %v896_v26 = vld [vmem:[%s2736_s7 + $0x70] sm:$0xff] }
  0x27   : > { %936 = vperm.xlu0 %1957, %v886_v27  }
  0x28   : > { %941 = vperm.xlu1 %1958, %v887_v28  }
  0x2b   : > { %1206 = vrot.lane.b32.xlu0 %v1124_v29, %s2056_s30  ;;  %v897_v29 = vld [vmem:[%s2736_s7 + $0x78] sm:$0xff] }
  0x2c   : > { %1208 = vrot.lane.b32.xlu1 %v1125_v30, %s2056_s30  ;;  %v1134_v30 = vld [vmem:[%s2737_s8 + $0xe0] sm:$0xff] }
  0x2f   : > { %1174 = vrot.lane.b32.xlu0 %v1108_v31, %s2056_s30  ;;  %v1135_v31 = vld [vmem:[%s2737_s8 + $0xe8] sm:$0xff] }
  0x30   : > { %1176 = vrot.lane.b32.xlu1 %v1109_v32, %s2056_s30 }
  0x33   : > { %1026 = vperm.xlu0 %1957, %v904_v33   ;;  %v1118_v33 = vld [vmem:[%s2737_s8 + $0x60] sm:$0xff] }
  0x34   : > { %1031 = vperm.xlu1 %1958, %v905_v34  }
  0x37   : > { %946 = vperm.xlu0 %1957, %v888_v35   ;;  %v1119_v35 = vld [vmem:[%s2737_s8 + $0x68] sm:$0xff] }
  0x38   : > { %951 = vperm.xlu1 %1958, %v889_v36   ;;  %v1136_v36 = vld [vmem:[%s2737_s8 + $0xf0] sm:$0xff] }
  0x3b   : > { %1210 = vrot.lane.b32.xlu0 %v1126_v37, %s2056_s30 }
  0x3c   : > { %1212 = vrot.lane.b32.xlu1 %v1127_v38, %s2056_s30 }
  0x3f   : > { %1178 = vrot.lane.b32.xlu0 %v1110_v39, %s2056_s30  ;;  %v1137_v39 = vld [vmem:[%s2737_s8 + $0xf8] sm:$0xff] }
  0x40   : > { %1180 = vrot.lane.b32.xlu1 %v1111_v40, %s2056_s30  ;;  %v1120_v40 = vld [vmem:[%s2737_s8 + $0x70] sm:$0xff] }
  0x43   : > { %1036 = vperm.xlu0 %1957, %v906_v41   ;;  %v1121_v41 = vld [vmem:[%s2737_s8 + $0x78] sm:$0xff] }
  0x44   : > { %1041 = vperm.xlu1 %1958, %v907_v42  }
  0x47   : > { %956 = vperm.xlu0 %1957, %v890_v43  }
  0x48   : > { %961 = vperm.xlu1 %1958, %v891_v44  }
  0x4b   : > { %1214 = vrot.lane.b32.xlu0 %v1128_v45, %s2056_s30 }
  0x88   : > { %v2332_v4 = vpop.permute.xlu0 %996 }
  0x89   : > { %v2341_v7 = vpop.permute.xlu1 %916 }
  0x8c   : > { %v2344_v8 = vpop.permute.xlu0 %1001 }
  0x8d   : > { %v2357_v12 = vpop.permute.xlu1 %921 }
  0x92   : > { %v2362_v14 = vpop.permute.xlu0 %1006 }
  0x93   : > { %v2370_v17 = vpop.permute.xlu1 %1011 }
  0x96   : > { %v2372_v18 = vpop.permute.xlu0 %926 }
  0x97   : > { %v2386_v22 = vpop.permute.xlu1 %931 }
  0x9a   : > { %v2391_v24 = vpop.permute.xlu0 %1202 }
  0x9b   : > { %v2400_v27 = vpop.permute.xlu1 %1204 }
  0x9e   : > { %v2402_v28 = vpop.permute.xlu0 %1170 }
  0x9f   : > { %v2414_v32 = vpop.permute.xlu1 %1172 }
  0xa2   : > { %v2419_v34 = vpop.permute.xlu0 %1016 }
  0xa3   : > { %v2429_v37 = vpop.permute.xlu1 %1021 }
  0xa6   : > { %v2432_v38 = vpop.permute.xlu0 %936 }
  0xa7   : > { %v2446_v42 = vpop.permute.xlu1 %941 }
  0xaa   : > { %v2448_v43 = vpop.permute.xlu0 %1206 }
  0xab   : > { %v2451_v44 = vpop.permute.xlu1 %1208 }
  0xae   : > { %v2453_v45 = vpop.permute.xlu0 %1174 }
  0xe5   : > { %v1874_v48 = vpop.f32.mrb[0].mxu0 }
  0xe6   : > { %v564_v50 = vmul.f32 %v1874_v48, %v562_v46  ;;  %v552_v51 = vpop.f32.mrb[1].mxu0  ;;  %v2455_v46 = vpop.permute.xlu1 %1176 }
  0xe7   : > { %v563_v53 = vmul.f32 %v561_v47, %v552_v51  ;;  %v2457_v47 = vpop.permute.xlu0 %1026 }
  0xe8   : > { %v2287_v54 = vadd.f32 %v566_v49, %v564_v50 }
  0xe9   : > { %v2289_v55 = vadd.f32 %v565_v52, %v563_v53  ;;  %v2057_v52 = vmov 1966171168  }
  0xea   : > { %v2742_v57 = vmax.f32 %v2287_v54, 0.0  ;;  %v2459_v48 = vpop.permute.xlu1 %1031  ;;  %v668_v53 = vunpack.c.l.s4 %v2057_v52 }
  0xeb   : > { %v2743_v56 = vmax.f32 %v2289_v55, 0.0  ;;  %v2461_v49 = vpop.permute.xlu0 %946 }
  0xed   : > { %1879 = vmatprep.mubr.msk.f32.mxu0 %vm584_vm1, %v2743_v56 }
  0xee   : > { %1880 = vmatmul.mubr.msk.f32.vlgmr.msra.gmra.mrb[2].mxu0 %vm584_vm1, %v2742_v57  ;;  %v2463_v50 = vpop.permute.xlu1 %951 }
  0xef   : > { %v2465_v51 = vpop.permute.xlu0 %1210 }
 0x1c1   : > { %v2297_v58 = vpop.f32.mrb[2].mxu0 }
 0x1c2   : > { %846 = vrot.lane.b32.xlu1 %v2297_v58, %s2056_s30  ;;  %v2301_v59 = vpop.f32.mrb[3].mxu0 }
 0x1c3   : > { %844 = vrot.lane.b32.xlu0 %v2301_v59, %s2056_s30 }
 0x1c6   : > { %1216 = vrot.lane.b32.xlu1 %v1129_v60, %s2056_s30  ;;  %v670_v60 = vlaneseq }
 0x1c7   : > { %1182 = vrot.lane.b32.xlu0 %v1112_v61, %s2056_s30  ;;  %v2467_v61 = vpop.permute.xlu1 %1212 }
 0x1ca   : > { %1184 = vrot.lane.b32.xlu1 %v1113_v62, %s2056_s30  ;;  %v669_v62 = vunpack.c.0.s8 %v668_v53 }
 0x1cb   : > { %1046 = vperm.xlu0 %1957, %v908_v63   ;;  %v2469_v63 = vshrl.u32 %v670_v60, 7 }
 0x1ce   : > { %1051 = vperm.xlu1 %1958, %v909_v0   ;;  %v2471_v0 = vpop.permute.xlu0 %1178 }
 0x1cf   : > { %966 = vperm.xlu0 %1957, %v892_v1   ;;  %v2474_v1 = vsub.s32 %v669_v62, %v2469_v63 }
 0x1d2   : > { %971 = vperm.xlu1 %1958, %v893_v2   ;;  %v2476_v2 = vpop.permute.xlu1 %1180 }
 0x1d3   : > { %1218 = vrot.lane.b32.xlu0 %v1130_v3, %s2056_s30  ;;  %v2478_v3 = vpop.permute.xlu0 %1036 }
 0x1d6   : > { %1220 = vrot.lane.b32.xlu1 %v1131_v5, %s2056_s30  ;;  %v722_v5 = vrot.slane %v2297_v58, %v2474_v1 }
 0x1d7   : > { %1186 = vrot.lane.b32.xlu0 %v1114_v6, %s2056_s30  ;;  %v673_v6 = vrot.slane %v2301_v59, %v2474_v1 }
 0x1da   : > { %1188 = vrot.lane.b32.xlu1 %v1115_v9, %s2056_s30  ;;  %v2484_v9 = vpop.permute.xlu1 %1041 }
 0x1db   : > { %1056 = vperm.xlu0 %1957, %v910_v10   ;;  %v715_v10 = vcombine.high %v2297_v58, %v2297_v58 }
 0x1de   : > { %1061 = vperm.xlu1 %1958, %v911_v11   ;;  %v730_v11 = vcombine.high %v722_v5, %v722_v5 }
 0x1df   : > { %976 = vperm.xlu0 %1957, %v894_v13   ;;  %v2488_v13 = vpop.permute.xlu0 %956 }
 0x1e2   : > { %981 = vperm.xlu1 %1958, %v895_v15   ;;  %v666_v15 = vcombine.high %v2301_v59, %v2301_v59 }
 0x1e3   : > { %1222 = vrot.lane.b32.xlu0 %v1132_v16, %s2056_s30  ;;  %v738_v16 = vrot.slane %v722_v5, %v2474_v1  ;;  %v2501_v58 = vpop.permute.xlu0 %1214 }
 0x1e5   : > { %v760_v59 = vcombine.high %v738_v16, %v738_v16 }
 0x1e6   : > { %1224 = vrot.lane.b32.xlu1 %v1133_v19, %s2056_s30  ;;  %v681_v19 = vcombine.high %v673_v6, %v673_v6 }
 0x1e7   : > { %1190 = vrot.lane.b32.xlu0 %v1116_v20, %s2056_s30  ;;  %v2494_v20 = vrot.slane %v715_v10, %v2474_v1 }
 0x1ea   : > { %1192 = vrot.lane.b32.xlu1 %v1117_v21, %s2056_s30  ;;  %v752_v21 = vrot.slane %v730_v11, %v2474_v1 }
 0x1eb   : > { %1066 = vperm.xlu0 %1957, %v912_v23   ;;  %v2498_v23 = vsub.s32 0, %v2469_v63 }
 0x1ed   : > { %v803_v53 = vrot.slane %v752_v21, %v2498_v23  ;;  %v807_v60 = vrot.slane %v760_v59, %v2498_v23 }
 0x1ee   : > { %1071 = vperm.xlu1 %1958, %v913_v25   ;;  %v689_v25 = vrot.slane %v673_v6, %v2474_v1 }
 0x1ef   : > { %986 = vperm.xlu0 %1957, %v896_v26   ;;  %v680_v26 = vrot.slane %v666_v15, %v2474_v1 }
 0x1f2   : > { %991 = vperm.xlu1 %1958, %v897_v29   ;;  %v2504_v29 = vpop.permute.xlu1 %961 }
 0x1f3   : > { %1226 = vrot.lane.b32.xlu0 %v1134_v30, %s2056_s30  ;;  %v703_v30 = vrot.slane %v681_v19, %v2474_v1 }
 0x1f5   : > { %v713_v10 = vcombine.high %v703_v30, %v703_v30  ;;  %v771_v11 = vrot.slane %v703_v30, %v2498_v23 }
 0x1f6   : > { %1228 = vrot.lane.b32.xlu1 %v1135_v31, %s2056_s30  ;;  %v731_v31 = vcombine.high %v2494_v20, %v2494_v20 }
 0x1f7   : > { %1194 = vrot.lane.b32.xlu0 %v1118_v33, %s2056_s30  ;;  %v799_v33 = vrot.slane %v738_v16, %v2498_v23 }
 0x1fa   : > { %1196 = vrot.lane.b32.xlu1 %v1119_v35, %s2056_s30  ;;  %v767_v35 = vrot.slane %v689_v25, %v2498_v23 }
 0x1fb   : > { %1230 = vrot.lane.b32.xlu0 %v1136_v36, %s2056_s30  ;;  %v762_v36 = vcombine.high %v752_v21, %v752_v21 }
 0x1fd   : > { %v811_v19 = vrot.slane %v762_v36, %v2498_v23 }
 0x1fe   : > { %1232 = vrot.lane.b32.xlu1 %v1137_v39, %s2056_s30  ;;  %v682_v39 = vcombine.high %v680_v26, %v680_v26 }
 0x1ff   : > { %1198 = vrot.lane.b32.xlu0 %v1120_v40, %s2056_s30  ;;  %v2512_v40 = vrot.slane %v680_v26, %v2474_v1  ;;  %v2529_v26 = vrot.slane %v731_v31, %v2474_v1  ;;  %v779_v31 = vrot.slane %v713_v10, %v2498_v23 }
 0x200   : > { %v2535_v30 = vrot.slane %v682_v39, %v2474_v1 }
 0x201   : > { %v763_v10 = vcombine.high %v2529_v26, %v2529_v26 }
 0x202   : > { %1200 = vrot.lane.b32.xlu1 %v1121_v41, %s2056_s30  ;;  %v711_v41 = vcombine.high %v689_v25, %v689_v25  ;;  %s2058_s30 = smov 120  }
 0x204   : > { %v775_v59 = vrot.slane %v711_v41, %v2498_v23 }
 0x234   : > { %v2514_v52 = vpop.permute.xlu1 %846 }
 0x235   : > { %v2518_v62 = vpop.permute.xlu0 %844  ;;  %v867_v5 = vadd.f32 %v2514_v52, %v799_v33  ;;  %v851_v6 = vadd.f32 %v2514_v52, %v767_v35 }
 0x236   : > { %v866_v15 = vadd.f32 %v2518_v62, %v799_v33  ;;  %v850_v16 = vadd.f32 %v2518_v62, %v767_v35  ;;  %v873_v33 = vadd.f32 %v2514_v52, %v811_v19 }
 0x237   : > { %v1091_v25 = vmul.f32 %v2344_v8, %v867_v5  ;;  %v1075_v21 = vmul.f32 %v2357_v12, %v851_v6  ;;  %v868_v12 = vadd.f32 %v2518_v62, %v803_v53  ;;  %v869_v6 = vadd.f32 %v2514_v52, %v803_v53 }
 0x238   : > { %v1090_v57 = vmul.f32 %v2332_v4, %v866_v15  ;;  %v1074_v56 = vmul.f32 %v2341_v7, %v850_v16  ;;  %v712_v4 = vcombine.high %v2512_v40, %v2512_v40  ;;  %v872_v7 = vadd.f32 %v2518_v62, %v811_v19  ;;  %v1217_v16 = vpop.permute.xlu1 %1216 }
 0x239   : > { %v1283_v35 = vadd.f32 %v2400_v27, %v1091_v25  ;;  %v1267_v8 = vadd.f32 %v2414_v32, %v1075_v21  ;;  %v857_v27 = vadd.f32 %v2514_v52, %v779_v31  ;;  %v856_v19 = vadd.f32 %v2518_v62, %v779_v31 }
 0x23a   : > { %v1282_v36 = vadd.f32 %v2391_v24, %v1090_v57  ;;  %v1266_v41 = vadd.f32 %v2402_v28, %v1074_v56  ;;  %v1097_v57 = vmul.f32 %v2459_v48, %v873_v33  ;;  %v1092_v56 = vmul.f32 %v2362_v14, %v868_v12 }
 0x23b   : > { %v1315_v39 = vmax.f32 %v1283_v35, 0.0  ;;  %v1299_v5 = vmax.f32 %v1267_v8, 0.0  ;;  %v1093_v24 = vmul.f32 %v2370_v17, %v869_v6  ;;  %v852_v28 = vadd.f32 %v2518_v62, %v771_v11 }
 0x23c   : > { %v1314_v32 = vmax.f32 %v1282_v36, 0.0  ;;  %v1298_v15 = vmax.f32 %v1266_v41, 0.0  ;;  %v853_v21 = vadd.f32 %v2514_v52, %v771_v11  ;;  %v1096_v35 = vmul.f32 %v2457_v47, %v872_v7 }
 0x23d   : > { %v1284_v8 = vadd.f32 %v2448_v43, %v1092_v56  ;;  %v1285_v36 = vadd.f32 %v2451_v44, %v1093_v24  ;;  %v1076_v48 = vmul.f32 %v2372_v18, %v852_v28  ;;  %v870_v17 = vadd.f32 %v2518_v62, %v807_v60 }
 0x23e   : > { %v1959_v25 = vpack.i.bf16 %v1315_v39, %v1314_v32  ;;  %v1964_v53 = vpack.i.bf16 %v1299_v5, %v1298_v15  ;;  %v1077_v14 = vmul.f32 %v2386_v22, %v853_v21  ;;  %v871_v33 = vadd.f32 %v2514_v52, %v807_v60  ;;  %v1185_v60 = vpop.permute.xlu1 %1184 }
 0x23f   : > { %v1289_v11 = vadd.f32 %v1217_v16, %v1097_v57  ;;  %v1316_v12 = vmax.f32 %v1284_v8, 0.0  ;;  %v1317_v47 = vmax.f32 %v1285_v36, 0.0  ;;  %v1268_v43 = vadd.f32 %v2453_v45, %v1076_v48 }
 0x240   : > { %1960 = vrot.lane.b32.xlu0 %v1959_v25, %s2058_s30  ;;  %1965 = vrot.lane.b32.xlu1 %v1964_v53, %s2058_s30  ;;  %v1269_v44 = vadd.f32 %v2455_v46, %v1077_v14  ;;  %v1094_v18 = vmul.f32 %v2419_v34, %v870_v17  ;;  %v1095_v31 = vmul.f32 %v2429_v37, %v871_v33 }
 0x241   : > { %v854_v41 = vadd.f32 %v2518_v62, %v775_v59  ;;  %v1288_v7 = vadd.f32 %v2501_v58, %v1096_v35  ;;  %v1969_v22 = vpack.i.bf16 %v1317_v47, %v1316_v12  ;;  %v1300_v39 = vmax.f32 %v1268_v43, 0.0 }
 0x242   : > { %v855_v5 = vadd.f32 %v2514_v52, %v775_v59  ;;  %v1301_v6 = vmax.f32 %v1269_v44, 0.0  ;;  %v1286_v32 = vadd.f32 %v2465_v51, %v1094_v18  ;;  %v1287_v45 = vadd.f32 %v2467_v61, %v1095_v31  ;;  %v1183_v59 = vpop.permute.xlu0 %1182 }
 0x243   : > { %v1078_v46 = vmul.f32 %v2432_v38, %v854_v41  ;;  %v1080_v34 = vmul.f32 %v2461_v49, %v856_v19  ;;  %v1081_v37 = vmul.f32 %v2463_v50, %v857_v27  ;;  %v714_v15 = vcombine.high %v2535_v30, %v2535_v30 }
 0x244   : > { %1970 = vrot.lane.b32.xlu0 %v1969_v22, %s2058_s30  ;;  %v1079_v58 = vmul.f32 %v2446_v42, %v855_v5  ;;  %v1974_v57 = vpack.i.bf16 %v1301_v6, %v1300_v39  ;;  %v1318_v56 = vmax.f32 %v1286_v32, 0.0  ;;  %v1319_v24 = vmax.f32 %v1287_v45, 0.0 }
 0x245   : > { %v1270_v51 = vadd.f32 %v2471_v0, %v1078_v46  ;;  %v2585_v38 = vrot.slane %v2494_v20, %v2474_v1  ;;  %v1273_v49 = vadd.f32 %v1185_v60, %v1081_v37  ;;  %v791_v61 = vrot.slane %v712_v4, %v2498_v23 }
 0x246   : > { %v1271_v50 = vadd.f32 %v2476_v2, %v1079_v58  ;;  %v1320_v27 = vmax.f32 %v1288_v7, 0.0  ;;  %v1321_v42 = vmax.f32 %v1289_v11, 0.0  ;;  %1975 = vrot.lane.b32.xlu1 %v1974_v57, %s2058_s30  ;;  %v1979_v28 = vpack.i.bf16 %v1319_v24, %v1318_v56 }
 0x247   : > { %v1302_v16 = vmax.f32 %v1270_v51, 0.0  ;;  %v1272_v19 = vadd.f32 %v1183_v59, %v1080_v34  ;;  %v827_v53 = vrot.slane %v763_v10, %v2498_v23  ;;  %v2593_v1 = vadd.f32 %v2518_v62, %v791_v61 }
 0x248   : > { %v1303_v25 = vmax.f32 %v1271_v50, 0.0  ;;  %1980 = vrot.lane.b32.xlu0 %v1979_v28, %s2058_s30  ;;  %v2596_v2 = vadd.f32 %v2514_v52, %v791_v61  ;;  %v795_v20 = vrot.slane %v714_v15, %v2498_v23  ;;  %v1305_v4 = vmax.f32 %v1273_v49, 0.0 }
 0x249   : > { %v2600_v35 = vadd.f32 %v2518_v62, %v827_v53  ;;  %v2603_v8 = vadd.f32 %v2514_v52, %v827_v53  ;;  %v1989_v10 = vpack.i.bf16 %v1321_v42, %v1320_v27  ;;  %v815_v36 = vrot.slane %v2585_v38, %v2498_v23 }
 0x24a   : > { %v1047_v0 = vpop.permute.xlu0 %1046  ;;  %v1984_v21 = vpack.i.bf16 %v1303_v25, %v1302_v16  ;;  %v2608_v48 = vadd.f32 %v2518_v62, %v795_v20  ;;  %v2611_v14 = vadd.f32 %v2514_v52, %v795_v20  ;;  %v1304_v17 = vmax.f32 %v1272_v19, 0.0 }
 0x24b   : > { %v874_v12 = vadd.f32 %v2518_v62, %v815_v36  ;;  %v875_v43 = vadd.f32 %v2514_v52, %v815_v36  ;;  %v783_v44 = vrot.slane %v2512_v40, %v2498_v23  ;;  %v819_v24 = vrot.slane %v2529_v26, %v2498_v23 }
 0x24c   : > { %1985 = vrot.lane.b32.xlu1 %v1984_v21, %s2058_s30  ;;  %1990 = vrot.lane.b32.xlu0 %v1989_v10, %s2058_s30  ;;  %v1994_v47 = vpack.i.bf16 %v1305_v4, %v1304_v17  ;;  %v787_v27 = vrot.slane %v2535_v30, %v2498_v23 }
 0x24d   : > { %v1052_v33 = vpop.permute.xlu1 %1051  ;;  %v1098_v31 = vmul.f32 %v2478_v3, %v874_v12  ;;  %v858_v7 = vadd.f32 %v2518_v62, %v783_v44  ;;  %v1099_v39 = vmul.f32 %v2484_v9, %v875_v43  ;;  %v859_v5 = vadd.f32 %v2514_v52, %v783_v44 }
 0x24e   : > { %v967_v11 = vpop.permute.xlu0 %966  ;;  %v877_v61 = vadd.f32 %v2514_v52, %v819_v24  ;;  %v860_v16 = vadd.f32 %v2518_v62, %v787_v27  ;;  %v861_v53 = vadd.f32 %v2514_v52, %v787_v27  ;;  %v761_v12 = vcombine.high %v2585_v38, %v2585_v38 }
 0x24f   : > { %v1082_v45 = vmul.f32 %v2488_v13, %v858_v7  ;;  %v1083_v37 = vmul.f32 %v2504_v29, %v859_v5  ;;  %v876_v13 = vadd.f32 %v2518_v62, %v819_v24 }
 0x250   : > { %1995 = vrot.lane.b32.xlu1 %v1994_v47, %s2058_s30  ;;  %v1101_v28 = vmul.f32 %v1052_v33, %v877_v61  ;;  %v1084_v26 = vmul.f32 %v967_v11, %v860_v16  ;;  %v2654_v16 = vld [vmem:[%s2738_s9] sm:$0x7f] }
 0x251   : > { %v972_v18 = vpop.permute.xlu1 %971  ;;  %v1100_v29 = vmul.f32 %v1047_v0, %v876_v13  ;;  %1860 = vmatprep.mubr.msk.f32.mxu1 %vm1427_vm2, %v2654_v16 }
 0x252   : > { %v1219_v41 = vpop.permute.xlu0 %1218  ;;  %v1085_v21 = vmul.f32 %v972_v18, %v861_v53 }
 0x253   : > { %v1290_v22 = vadd.f32 %v1219_v41, %v1098_v31  ;;  %v823_v31 = vrot.slane %v761_v12, %v2498_v23 }
 0x255   : > { %v1221_v60 = vpop.permute.xlu1 %1220  ;;  %v1322_v46 = vmax.f32 %v1290_v22, 0.0  ;;  %v878_v18 = vadd.f32 %v2518_v62, %v823_v31  ;;  %v879_v38 = vadd.f32 %v2514_v52, %v823_v31 }
 0x256   : > { %v1291_v6 = vadd.f32 %v1221_v60, %v1099_v39  ;;  %v1187_v32 = vpop.permute.xlu0 %1186 }
 0x257   : > { %v1274_v34 = vadd.f32 %v1187_v32, %v1082_v45 }
 0x258   : > { %v1323_v40 = vmax.f32 %v1291_v6, 0.0 }
 0x259   : > { %v1189_v58 = vpop.permute.xlu1 %1188  ;;  %v1306_v57 = vmax.f32 %v1274_v34, 0.0 }
 0x25a   : > { %v1999_v3 = vpack.i.bf16 %v1323_v40, %v1322_v46  ;;  %v1275_v15 = vadd.f32 %v1189_v58, %v1083_v37  ;;  %v1057_v59 = vpop.permute.xlu0 %1056 }
 0x25b   : > { %v1102_v39 = vmul.f32 %v1057_v59, %v878_v18 }
 0x25c   : > { %v1307_v56 = vmax.f32 %v1275_v15, 0.0  ;;  %2000 = vrot.lane.b32.xlu0 %v1999_v3, %s2058_s30 }
 0x25d   : > { %v1062_v9 = vpop.permute.xlu1 %1061 }
 0x25e   : > { %v2004_v51 = vpack.i.bf16 %v1307_v56, %v1306_v57  ;;  %v977_v49 = vpop.permute.xlu0 %976  ;;  %v1103_v60 = vmul.f32 %v1062_v9, %v879_v38 }
 0x25f   : > { %v1086_v45 = vmul.f32 %v977_v49, %v2593_v1 }
 0x260   : > { %2005 = vrot.lane.b32.xlu1 %v2004_v51, %s2058_s30 }
 0x261   : > { %v982_v50 = vpop.permute.xlu1 %981 }
 0x262   : > { %v1223_v42 = vpop.permute.xlu0 %1222  ;;  %v1087_v34 = vmul.f32 %v982_v50, %v2596_v2 }
 0x263   : > { %v1292_v19 = vadd.f32 %v1223_v42, %v1100_v29 }
 0x265   : > { %v1225_v25 = vpop.permute.xlu1 %1224  ;;  %v1324_v10 = vmax.f32 %v1292_v19, 0.0 }
 0x266   : > { %v1293_v20 = vadd.f32 %v1225_v25, %v1101_v28  ;;  %v1191_v4 = vpop.permute.xlu0 %1190  ;;  %v2744_v25 = vmax.f32 %v2289_v55, 0.0 }
 0x267   : > { %v1276_v0 = vadd.f32 %v1191_v4, %v1084_v26  ;;  %v2745_v26 = vmax.f32 %v2287_v54, 0.0 }
 0x268   : > { %v1325_v36 = vmax.f32 %v1293_v20, 0.0 }
 0x269   : > { %v1193_v17 = vpop.permute.xlu1 %1192  ;;  %v1308_v43 = vmax.f32 %v1276_v0, 0.0 }
 0x26a   : > { %v2009_v30 = vpack.i.bf16 %v1325_v36, %v1324_v10  ;;  %v1277_v47 = vadd.f32 %v1193_v17, %v1085_v21  ;;  %v1067_v33 = vpop.permute.xlu0 %1066 }
 0x26b   : > { %v1104_v15 = vmul.f32 %v1067_v33, %v2600_v35 }
 0x26c   : > { %v1309_v44 = vmax.f32 %v1277_v47, 0.0  ;;  %2010 = vrot.lane.b32.xlu0 %v2009_v30, %s2058_s30 }
 0x26d   : > { %v1072_v11 = vpop.permute.xlu1 %1071 }
 0x26e   : > { %v2014_v41 = vpack.i.bf16 %v1309_v44, %v1308_v43  ;;  %v987_v7 = vpop.permute.xlu0 %986  ;;  %v1105_v52 = vmul.f32 %v1072_v11, %v2603_v8 }
 0x26f   : > { %v1088_v49 = vmul.f32 %v987_v7, %v2608_v48 }
 0x270   : > { %2015 = vrot.lane.b32.xlu1 %v2014_v41, %s2058_s30 }
 0x271   : > { %v992_v22 = vpop.permute.xlu1 %991 }
 0x272   : > { %v1227_v5 = vpop.permute.xlu0 %1226  ;;  %v1089_v29 = vmul.f32 %v992_v22, %v2611_v14 }
 0x273   : > { %v1294_v6 = vadd.f32 %v1227_v5, %v1102_v39 }
 0x275   : > { %v1229_v32 = vpop.permute.xlu1 %1228  ;;  %v1326_v37 = vmax.f32 %v1294_v6, 0.0 }
 0x276   : > { %v1295_v46 = vadd.f32 %v1229_v32, %v1103_v60  ;;  %v1195_v40 = vpop.permute.xlu0 %1194 }
 0x277   : > { %v1278_v3 = vadd.f32 %v1195_v40, %v1086_v45 }
 0x278   : > { %v1327_v58 = vmax.f32 %v1295_v46, 0.0 }
 0x279   : > { %v1197_v62 = vpop.permute.xlu1 %1196  ;;  %v1310_v9 = vmax.f32 %v1278_v3, 0.0 }
 0x27a   : > { %v2019_v57 = vpack.i.bf16 %v1327_v58, %v1326_v37  ;;  %v1279_v59 = vadd.f32 %v1197_v62, %v1087_v34  ;;  %v1231_v56 = vpop.permute.xlu0 %1230 }
 0x27b   : > { %v1296_v51 = vadd.f32 %v1231_v56, %v1104_v15 }
 0x27c   : > { %v1311_v24 = vmax.f32 %v1279_v59, 0.0  ;;  %2020 = vrot.lane.b32.xlu0 %v2019_v57, %s2058_s30 }
 0x27d   : > { %v1233_v1 = vpop.permute.xlu1 %1232  ;;  %v1328_v61 = vmax.f32 %v1296_v51, 0.0 }
 0x27e   : > { %v2024_v2 = vpack.i.bf16 %v1311_v24, %v1310_v9  ;;  %v1297_v13 = vadd.f32 %v1233_v1, %v1105_v52  ;;  %v1199_v50 = vpop.permute.xlu0 %1198 }
 0x27f   : > { %v1280_v27 = vadd.f32 %v1199_v50, %v1088_v49 }
 0x280   : > { %v1329_v35 = vmax.f32 %v1297_v13, 0.0  ;;  %2025 = vrot.lane.b32.xlu1 %v2024_v2, %s2058_s30 }
 0x281   : > { %v1201_v42 = vpop.permute.xlu1 %1200  ;;  %v1312_v48 = vmax.f32 %v1280_v27, 0.0 }
 0x282   : > { %v2029_v8 = vpack.i.bf16 %v1329_v35, %v1328_v61  ;;  %v1281_v28 = vadd.f32 %v1201_v42, %v1089_v29 }
 0x284   : > { %v1313_v19 = vmax.f32 %v1281_v28, 0.0  ;;  %2030 = vrot.lane.b32.xlu0 %v2029_v8, %s2058_s30 }
 0x286   : > { %v2034_v14 = vpack.i.bf16 %v1313_v19, %v1312_v48 }
 0x288   : > { %2035 = vrot.lane.b32.xlu1 %v2034_v14, %s2058_s30 }
 0x28c   : > { %573 = vrot.lane.b32.xlu1 %v2744_v25, %s2059_s20 }
 0x290   : > { %575 = vrot.lane.b32.xlu1 %v2745_v26, %s2059_s20 }
 0x2b2   : > { %v1961_v53 = vpop.permute.xlu0 %1960  ;;  %v1966_v20 = vpop.permute.xlu1 %1965 }
 0x2b3   : > { %v1963_v4 = vunpack.i.h.bf16 %v1961_v53  ;;  %v1962_v21 = vunpack.i.l.bf16 %v1961_v53  ;;  %v1968_v10 = vunpack.i.h.bf16 %v1966_v20  ;;  %v1967_v36 = vunpack.i.l.bf16 %v1966_v20 }
 0x2b5   : > { %v1897_v17 = vpack.c.bf16 %v1968_v10, %v1967_v36  ;;  %v1894_v12 = vpack.c.bf16 %v1963_v4, %v1962_v21 }
 0x2b6   : > { %v1971_v30 = vpop.permute.xlu0 %1970 }
 0x2b7   : > { %1896 = vmatprep.subr.msk.bf16.mxu1 %vm2666_vm3, %v1894_v12  ;;  %v1973_v54 = vunpack.i.h.bf16 %v1971_v30  ;;  %v1972_v55 = vunpack.i.l.bf16 %v1971_v30 }
 0x2b8   : > { %1899 = vmatpush3.bf16.xpose.msk.msra.mxu1 %vm2666_vm3, %v1897_v17  ;;  %v1976_v33 = vpop.permute.xlu1 %1975 }
 0x2b9   : > { %v1900_v47 = vpack.c.bf16 %v1973_v54, %v1972_v55  ;;  %v1978_v43 = vunpack.i.h.bf16 %v1976_v33  ;;  %v1977_v44 = vunpack.i.l.bf16 %v1976_v33 }
 0x2ba   : > { %v1981_v11 = vpop.permute.xlu0 %1980 }
 0x2bb   : > { %1902 = vmatprep.subr.msk.bf16.mxu1 %vm2666_vm3, %v1900_v47  ;;  %v1983_v31 = vunpack.i.h.bf16 %v1981_v11  ;;  %v1982_v41 = vunpack.i.l.bf16 %v1981_v11  ;;  %v1903_v7 = vpack.c.bf16 %v1978_v43, %v1977_v44 }
 0x2bd   : > { %v1906_v18 = vpack.c.bf16 %v1983_v31, %v1982_v41  ;;  %v1568_v31 = vld [vmem:[%s454_s16] sm:$0xff] }
 0x2be   : > { %v1986_v22 = vpop.permute.xlu1 %1985  ;;  %v1991_v39 = vpop.permute.xlu0 %1990  ;;  %v1569_v41 = vunpack.c.l.bf16 %v1568_v31 }
 0x2bf   : > { %v1988_v38 = vunpack.i.h.bf16 %v1986_v22  ;;  %v1987_v5 = vunpack.i.l.bf16 %v1986_v22  ;;  %v1993_v60 = vunpack.i.h.bf16 %v1991_v39  ;;  %v1992_v6 = vunpack.i.l.bf16 %v1991_v39 }
 0x2c0   : > { %1905 = vmatpush3.bf16.xpose.msk.msra.mxu1 %vm2666_vm3, %v1903_v7  ;;  %v1570_v7 = vunpack.c.h.bf16 %v1568_v31 }
 0x2c1   : > { %1908 = vmatprep.subr.msk.bf16.mxu1 %vm2666_vm3, %v1906_v18  ;;  %v1909_v32 = vpack.c.bf16 %v1988_v38, %v1987_v5  ;;  %v1912_v45 = vpack.c.bf16 %v1993_v60, %v1992_v6  ;;  %v1571_v5 = vld [vmem:[%s458_s18] sm:$0x3]  ;;  %v1601_v60 = vsub.s32 1, %v2469_v63 }
 0x2c2   : > { %v1996_v46 = vpop.permute.xlu1 %1995 }
 0x2c3   : > { %v1998_v40 = vunpack.i.h.bf16 %v1996_v46  ;;  %v1997_v34 = vunpack.i.l.bf16 %v1996_v46 }
 0x2c5   : > { %v1915_v37 = vpack.c.bf16 %v1998_v40, %v1997_v34  ;;  %v1598_v40 = vrot.slane %v1571_v5, %v2498_v23 }
 0x2c8   : > { %1911 = vmatpush3.bf16.xpose.msk.msra.mxu1 %vm2666_vm3, %v1909_v32 }
 0x2c9   : > { %1914 = vmatprep.subr.msk.bf16.mxu1 %vm2666_vm3, %v1912_v45 }
 0x2ce   : > { %v2001_v58 = vpop.permute.xlu0 %2000 }
 0x2cf   : > { %v2003_v3 = vunpack.i.h.bf16 %v2001_v58  ;;  %v2002_v62 = vunpack.i.l.bf16 %v2001_v58  ;;  %v1602_v58 = vrot.slane %v1571_v5, %v1601_v60 }
 0x2d0   : > { %1917 = vmatpush3.bf16.xpose.msk.msra.mxu1 %vm2666_vm3, %v1915_v37 }
 0x2d1   : > { %v1918_v15 = vpack.c.bf16 %v2003_v3, %v2002_v62 }
 0x2d2   : > { %v2006_v57 = vpop.permute.xlu1 %2005 }
 0x2d3   : > { %v2008_v59 = vunpack.i.h.bf16 %v2006_v57  ;;  %v2007_v56 = vunpack.i.l.bf16 %v2006_v57  ;;  %1920 = vmatprep.subr.msk.bf16.mxu1 %vm2666_vm3, %v1918_v15 }
 0x2d5   : > { %v1921_v52 = vpack.c.bf16 %v2008_v59, %v2007_v56 }
 0x2d8   : > { %1923 = vmatpush3.bf16.xpose.msk.msra.mxu1 %vm2666_vm3, %v1921_v52 }
 0x2de   : > { %v2011_v9 = vpop.permute.xlu0 %2010 }
 0x2df   : > { %v2013_v24 = vunpack.i.h.bf16 %v2011_v9  ;;  %v2012_v51 = vunpack.i.l.bf16 %v2011_v9 }
 0x2e1   : > { %v1924_v1 = vpack.c.bf16 %v2013_v24, %v2012_v51 }
 0x2e2   : > { %v2016_v49 = vpop.permute.xlu1 %2015 }
 0x2e3   : > { %v2018_v2 = vunpack.i.h.bf16 %v2016_v49  ;;  %v2017_v13 = vunpack.i.l.bf16 %v2016_v49  ;;  %1926 = vmatprep.subr.msk.bf16.mxu1 %vm2666_vm3, %v1924_v1 }
 0x2e5   : > { %v1927_v50 = vpack.c.bf16 %v2018_v2, %v2017_v13 }
 0x2e7   : > { %1929 = vmatpush3.bf16.xpose.msk.msra.mxu1 %vm2666_vm3, %v1927_v50 }
 0x2ee   : > { %v2021_v29 = vpop.permute.xlu0 %2020 }
 0x2ef   : > { %v2023_v61 = vunpack.i.h.bf16 %v2021_v29  ;;  %v2022_v35 = vunpack.i.l.bf16 %v2021_v29 }
 0x2f1   : > { %v1930_v27 = vpack.c.bf16 %v2023_v61, %v2022_v35 }
 0x2f2   : > { %v2026_v42 = vpop.permute.xlu1 %2025 }
 0x2f3   : > { %v2028_v8 = vunpack.i.h.bf16 %v2026_v42  ;;  %v2027_v28 = vunpack.i.l.bf16 %v2026_v42  ;;  %1932 = vmatprep.subr.msk.bf16.mxu1 %vm2666_vm3, %v1930_v27 }
 0x2f5   : > { %v1933_v48 = vpack.c.bf16 %v2028_v8, %v2027_v28 }
 0x2f6   : > { %v2031_v19 = vpop.permute.xlu0 %2030 }
 0x2f7   : > { %v2033_v14 = vunpack.i.h.bf16 %v2031_v19  ;;  %v2032_v25 = vunpack.i.l.bf16 %v2031_v19  ;;  %1935 = vmatpush3.bf16.xpose.msk.msra.mxu1 %vm2666_vm3, %v1933_v48 }
 0x2f9   : > { %v1936_v26 = vpack.c.bf16 %v2033_v14, %v2032_v25 }
 0x2fa   : > { %v2036_v53 = vpop.permute.xlu1 %2035 }
 0x2fb   : > { %v2038_v20 = vunpack.i.h.bf16 %v2036_v53  ;;  %v2037_v4 = vunpack.i.l.bf16 %v2036_v53  ;;  %1938 = vmatprep.subr.msk.bf16.mxu1 %vm2666_vm3, %v1936_v26 }
 0x2fd   : > { %v1939_v21 = vpack.c.bf16 %v2038_v20, %v2037_v4 }
 0x2fe   : > { %v574_v10 = vpop.permute.xlu1 %573 }
 0x2ff   : > { %580 = vst.msk [vmem:[%s463_s25] sm:$0xff] %vm579_vm4, %v574_v10  ;;  %1941 = vmatpush3.bf16.xpose.msk.msra.mxu1 %vm2666_vm3, %v1939_v21 }
 0x302   : > { %v576_v36 = vpop.permute.xlu1 %575 }
 0x303   : > { %581 = vst.msk [vmem:[%s463_s25 + $0x8] sm:$0xff] %vm579_vm4, %v576_v36 }
 0x306   : > { %1861 = vmatmul.mubr.msk.f32.vlgmr.msra.gmra.mrb[0].mxu1 %vm1427_vm2, %v2654_v16 }
 0x3d9   : > { %v1561_v17 = vpop.f32.mrb[0].mxu1 }
 0x3da   : > { %v1578_v12 = vand.u32 2147483647, %v1561_v17  ;;  %v1563_v30 = vpop.f32.mrb[1].mxu1  ;;  %1566 = vst [vmem:[%s468_s28] sm:$0x7f] %v1561_v17  ;;  %v1572_v18 = vmax.f32 %v1561_v17, 0.0  ;;  %v1574_v22 = vmul.f32 %v1569_v41, %v1561_v17 }
 0x3db   : > { %1567 = vst [vmem:[%s468_s28 + $0x8] sm:$0x7f] %v1563_v30  ;;  %v1579_v54 = vand.u32 2147483647, %v1563_v30  ;;  %v1573_v39 = vmax.f32 %v1563_v30, 0.0  ;;  %v1575_v38 = vmul.f32 %v1570_v7, %v1563_v30 }
 0x3dc   : > { %v1580_v55 = vsub.f32 0.0, %v1578_v12  ;;  %v1576_v45 = vsub.f32 %v1572_v18, %v1574_v22 }
 0x3dd   : > { %v1581_v0 = vsub.f32 0.0, %v1579_v54  ;;  %v1577_v34 = vsub.f32 %v1573_v39, %v1575_v38 }
 0x3de   : > { %v1582_v47 = vmul.f32 1.442695, %v1580_v55 }
 0x3df   : > { %v1584_v33 = vmul.f32 1.442695, %v1581_v0 }
 0x3e0   : > { %2039 = vpow2.f32 %v1582_v47 }
 0x3e1   : > { %2041 = vpow2.f32 %v1584_v33 }
 0x3ea   : > { %v2040_v43 = vpop.eup %2039 }
 0x3eb   : > { %v2042_v16 = vpop.eup %2041  ;;  %v1586_v44 = vadd.f32 1.0, %v2040_v43 }
 0x3ec   : > { %v1587_v11 = vadd.f32 1.0, %v2042_v16 }
 0x3ed   : > { %2043 = vlog2.f32 %v1586_v44 }
 0x3ee   : > { %2045 = vlog2.f32 %v1587_v11 }
 0x3f7   : > { %v2044_v6 = vpop.eup %2043 }
 0x3f8   : > { %v2046_v32 = vpop.eup %2045  ;;  %v1589_v46 = vmul.f32 0.6931472, %v2044_v6 }
 0x3f9   : > { %v1591_v37 = vmul.f32 0.6931472, %v2046_v32 }
 0x3fa   : > { %v1592_v3 = vadd.f32 %v1589_v46, %v1576_v45 }
 0x3fb   : > { %v1593_v62 = vadd.f32 %v1591_v37, %v1577_v34 }
 0x3fc   : > { %v1605_v15 = vmul.f32 %v1598_v40, %v1592_v3 }
 0x3fd   : > { %v1606_v57 = vmul.f32 %v1602_v58, %v1593_v62 }
 0x3fe   : > { %v1608_v59 = vsel %vm1607_vm5, %v1605_v15, 0.0 }
 0x3ff   : > { %v1609_v56 = vsel %vm1607_vm5, %v1606_v57, 0.0 }
 0x400   : > { %v1610_v52 = vadd.f32 %v1609_v56, %v1608_v59 }
 0x402   : > { %1611 = vadd.xlane.f32.xlu0 %v1610_v52 }
 0x48f   : > { %v1612_v63 = vpop.xlane.xlu0 %1611 }
 0x490   : > { %v1613_v9 = vrot.slane %v1612_v63, 4 }
 0x492   : > { %v1614_v24 = vadd.f32 %v1613_v9, %v1612_v63 }
 0x494   : > { %v1615_v51 = vrot.slane %v1614_v24, 2 }
 0x496   : > { %v1616_v1 = vadd.f32 %v1615_v51, %v1614_v24 }
 0x498   : > { %v1617_v49 = vrot.slane %v1616_v1, 1 }
 0x49a   : > { %v1618_v23 = vadd.f32 %v1617_v49, %v1616_v1 }
 0x49c   : > { %1942 = vpush %v1618_v23 }
 0x4cd   : > { %s1943_s24 = spop %1942 }
 0x4ce   : > { %v1620_v2 = vstv %s1943_s24 }
 0x4cf   : > { %1622 = vst [vmem:[%s471_s23] sm:$0x1] %v1620_v2 }
 0x4d0 PF: > { %s23_s21 = sadd.s32 1, %s2053_s21  }
 0x4d1   : > { %p20_p4 = scmp.ge.s32.totalorder %s23_s21, 4  }
 0x4d3   :  { %22 = sbr.rel (!%p20_p4) target bundleno = 1 (0x1), region = 120 }

</bundles_post_ra>
